<compile_context>
chip_gen: v6e
topology: v6e:2x2x1
jax: 0.10.0
libtpu: 0.0.40
codegen_flags: <defaults>
</compile_context>

<pallas_src>
import jax
import jax.numpy as jnp
import numpy as np
from jax.experimental import pallas as pl
from jax.experimental.pallas import tpu as pltpu


def _encoder_conv_kernel(w_ref, b_ref, x_ref, loc_ref, scale_ref):
    # w_ref: SMEM (15,) f32  -- [conv11, conv12, conv13, conv21, conv22] x 3 taps
    # b_ref: SMEM (5,)  f32
    # x_ref: VMEM (TB, Lpad) f32, lane-padded to a multiple of 128
    # loc_ref / scale_ref: VMEM (TB, Lz) f32 with Lz = L - 8
    lpad = x_ref.shape[-1]
    lz = loc_ref.shape[-1]

    # Hoist the 20 SMEM scalar reads (read once, reuse everywhere).
    w = [w_ref[i] for i in range(15)]
    b = [b_ref[i] for i in range(5)]

    def shifted(h):
        # shifted(h)[k][i] == h[i + k] on the valid prefix; the wrapped tail
        # lanes are garbage that never reaches the (aligned) final store.
        # Rolls run on the otherwise-idle XLU slot; full-width vregs stay
        # unmasked throughout.
        return (h,
                pltpu.roll(h, lpad - 1, 1),   # == jnp.roll(h, -1, axis=1)
                pltpu.roll(h, lpad - 2, 1))   # == jnp.roll(h, -2, axis=1)

    def conv3(h0, h1, h2, layer):
        # 3-tap FIR on fixed-width, unmasked vregs.
        return (w[3 * layer] * h0
                + w[3 * layer + 1] * h1
                + w[3 * layer + 2] * h2
                + b[layer])

    def softplus(v):
        # Numerically stable softplus (matches torch.nn.Softplus, beta=1).
        return jnp.maximum(v, 0.0) + jnp.log1p(jnp.exp(-jnp.abs(v)))

    h = softplus(conv3(*shifted(x_ref[...]), 0))   # conv11 -> softplus
    h = softplus(conv3(*shifted(h), 1))            # conv12 -> softplus
    h = softplus(conv3(*shifted(h), 2))            # conv13 -> softplus

    s0, s1, s2 = shifted(h)                        # shared by both heads
    loc_ref[...] = conv3(s0, s1, s2, 3)[:, :lz]              # conv21
    scale_ref[...] = jnp.exp(conv3(s0, s1, s2, 4))[:, :lz]   # exp(conv22)


def encoder_conv(x, weights, biases, *, tb=512):
    """x: (B, 1, L) f32 (NCL, like PyTorch).  weights: (5, 3), biases: (5,).

    Returns (z_loc, z_scale), each (B, L - 8) — matching `z[:, 0, :]`."""
    B, C, L = x.shape
    assert C == 1
    assert L > 8
    Lz = L - 8                                      # four valid k=3 convs per head
    Lpad = max(128, ((L + 127) // 128) * 128)       # lane-pad the working width

    x2 = x[:, 0, :]                                 # squeeze channel -> (B, L)
    if Lpad != L:
        x2 = jnp.pad(x2, ((0, 0), (0, Lpad - L)))   # <128 extra lanes; negligible at scale

    # Batch tile: either the full (small) batch or a VMEM-friendly multiple of 8.
    TB = B if B <= tb else tb
    grid = (pl.cdiv(B, TB),)

    # NOTE: for very long L one could additionally tile the sequence axis with
    # an 8-element halo; not needed at these sizes (tiles are << VMEM even on v7x).
    return pl.pallas_call(
        _encoder_conv_kernel,
        out_shape=(jax.ShapeDtypeStruct((B, Lz), jnp.float32),
                   jax.ShapeDtypeStruct((B, Lz), jnp.float32)),
        grid_spec=pltpu.PrefetchScalarGridSpec(
            num_scalar_prefetch=0,
            grid=grid,
            in_specs=[
                pl.BlockSpec(memory_space=pltpu.MemorySpace.SMEM),   # taps   (15,)
                pl.BlockSpec(memory_space=pltpu.MemorySpace.SMEM),   # biases (5,)
                pl.BlockSpec((TB, Lpad), lambda i: (i, 0)),          # x tile
            ],
            out_specs=(
                pl.BlockSpec((TB, Lz), lambda i: (i, 0)),            # z_loc tile
                pl.BlockSpec((TB, Lz), lambda i: (i, 0)),            # z_scale tile
            ),
        ),
        compiler_params=pltpu.CompilerParams(
            dimension_semantics=("parallel",),   # shard batch tiles across TCs on v7x
        ),
    )(weights.reshape(-1), biases, x2)


def _reference(x, weights, biases):
    """Pure-JAX reference matching the PyTorch forward (slicing-based)."""
    def conv3(h, idx):
        lout = h.shape[1] - 2
        return (weights[idx, 0] * h[:, 0:lout]
                + weights[idx, 1] * h[:, 1:lout + 1]
                + weights[idx, 2] * h[:, 2:lout + 2]
                + biases[idx])
    h = x[:, 0, :]
    h = jax.nn.softplus(conv3(h, 0))
    h = jax.nn.softplus(conv3(h, 1))
    h = jax.nn.softplus(conv3(h, 2))
    return conv3(h, 3), jnp.exp(conv3(h, 4))


if __name__ == "__main__":
    key = jax.random.PRNGKey(0)
    k_x, k_w, k_b = jax.random.split(key, 3)

    B = 8
    L = 136          # input_dim; z dim = L - 8 = 128 (lane-dense outputs)

    x = jax.random.normal(k_x, (B, 1, L), dtype=jnp.float32)
    # 5x Conv1d(1, 1, 3) -> weights (5, 3), biases (5,), deterministic init
    weights = 0.3 * jax.random.normal(k_w, (5, 3), dtype=jnp.float32)
    biases = 0.1 * jax.random.normal(k_b, (5,), dtype=jnp.float32)

    z_loc, z_scale = encoder_conv(x, weights, biases)
    jax.block_until_ready((z_loc, z_scale))

    ref_loc, ref_scale = _reference(x, weights, biases)
    assert z_loc.shape == (B, L - 8) and z_scale.shape == (B, L - 8)
    np.testing.assert_allclose(np.asarray(z_loc), np.asarray(ref_loc), rtol=1e-5, atol=1e-5)
    np.testing.assert_allclose(np.asarray(z_scale), np.asarray(ref_scale), rtol=1e-5, atol=1e-5)

    print("KERNEL_OK")
</pallas_src>

<mosaic_0001>
module attributes {stable_mosaic.version = 11 : i64} {
  func.func @_encoder_conv_kernel(%arg0: i32, %arg1: memref<15xf32, #tpu.memory_space<smem>>, %arg2: memref<5xf32, #tpu.memory_space<smem>>, %arg3: memref<8x256xf32, #tpu.memory_space<vmem>>, %arg4: memref<8x128xf32, #tpu.memory_space<vmem>>, %arg5: memref<8x128xf32, #tpu.memory_space<vmem>>) attributes {dimension_semantics = [#tpu.dimension_semantics<parallel>], iteration_bounds = array<i64: 1>, scalar_prefetch = 0 : i64, scratch_operands = 0 : i64, tpu.core_type = #tpu.core_type<tc>, window_params = [{transform_indices = @transform_0, window_bounds = array<i64: 15>}, {transform_indices = @transform_1, window_bounds = array<i64: 5>}, {transform_indices = @transform_2, window_bounds = array<i64: 8, 256>}, {transform_indices = @transform_3, window_bounds = array<i64: 8, 128>}, {transform_indices = @transform_4, window_bounds = array<i64: 8, 128>}]} {
    %c0 = arith.constant 0 : index
    %0 = memref.load %arg1[%c0] : memref<15xf32, #tpu.memory_space<smem>>
    %c1 = arith.constant 1 : index
    %1 = memref.load %arg1[%c1] : memref<15xf32, #tpu.memory_space<smem>>
    %c2 = arith.constant 2 : index
    %2 = memref.load %arg1[%c2] : memref<15xf32, #tpu.memory_space<smem>>
    %c3 = arith.constant 3 : index
    %3 = memref.load %arg1[%c3] : memref<15xf32, #tpu.memory_space<smem>>
    %c4 = arith.constant 4 : index
    %4 = memref.load %arg1[%c4] : memref<15xf32, #tpu.memory_space<smem>>
    %c5 = arith.constant 5 : index
    %5 = memref.load %arg1[%c5] : memref<15xf32, #tpu.memory_space<smem>>
    %c6 = arith.constant 6 : index
    %6 = memref.load %arg1[%c6] : memref<15xf32, #tpu.memory_space<smem>>
    %c7 = arith.constant 7 : index
    %7 = memref.load %arg1[%c7] : memref<15xf32, #tpu.memory_space<smem>>
    %c8 = arith.constant 8 : index
    %8 = memref.load %arg1[%c8] : memref<15xf32, #tpu.memory_space<smem>>
    %c9 = arith.constant 9 : index
    %9 = memref.load %arg1[%c9] : memref<15xf32, #tpu.memory_space<smem>>
    %c10 = arith.constant 10 : index
    %10 = memref.load %arg1[%c10] : memref<15xf32, #tpu.memory_space<smem>>
    %c11 = arith.constant 11 : index
    %11 = memref.load %arg1[%c11] : memref<15xf32, #tpu.memory_space<smem>>
    %c12 = arith.constant 12 : index
    %12 = memref.load %arg1[%c12] : memref<15xf32, #tpu.memory_space<smem>>
    %c13 = arith.constant 13 : index
    %13 = memref.load %arg1[%c13] : memref<15xf32, #tpu.memory_space<smem>>
    %c14 = arith.constant 14 : index
    %14 = memref.load %arg1[%c14] : memref<15xf32, #tpu.memory_space<smem>>
    %c0_0 = arith.constant 0 : index
    %15 = memref.load %arg2[%c0_0] : memref<5xf32, #tpu.memory_space<smem>>
    %c1_1 = arith.constant 1 : index
    %16 = memref.load %arg2[%c1_1] : memref<5xf32, #tpu.memory_space<smem>>
    %c2_2 = arith.constant 2 : index
    %17 = memref.load %arg2[%c2_2] : memref<5xf32, #tpu.memory_space<smem>>
    %c3_3 = arith.constant 3 : index
    %18 = memref.load %arg2[%c3_3] : memref<5xf32, #tpu.memory_space<smem>>
    %c4_4 = arith.constant 4 : index
    %19 = memref.load %arg2[%c4_4] : memref<5xf32, #tpu.memory_space<smem>>
    %c0_5 = arith.constant 0 : index
    %c0_6 = arith.constant 0 : index
    %20 = vector.load %arg3[%c0_5, %c0_6] : memref<8x256xf32, #tpu.memory_space<vmem>>, vector<8x256xf32>
    %c255_i32 = arith.constant 255 : i32
    %21 = tpu.dynamic_rotate %20 by %c255_i32 dim 1 : vector<8x256xf32>, i32 -> vector<8x256xf32>
    %c254_i32 = arith.constant 254 : i32
    %22 = tpu.dynamic_rotate %20 by %c254_i32 dim 1 : vector<8x256xf32>, i32 -> vector<8x256xf32>
    %23 = vector.broadcast %0 : f32 to vector<8x256xf32>
    %24 = arith.mulf %23, %20 : vector<8x256xf32>
    %25 = vector.broadcast %1 : f32 to vector<8x256xf32>
    %26 = arith.mulf %25, %21 : vector<8x256xf32>
    %27 = arith.addf %24, %26 : vector<8x256xf32>
    %28 = vector.broadcast %2 : f32 to vector<8x256xf32>
    %29 = arith.mulf %28, %22 : vector<8x256xf32>
    %30 = arith.addf %27, %29 : vector<8x256xf32>
    %31 = vector.broadcast %15 : f32 to vector<8x256xf32>
    %32 = arith.addf %30, %31 : vector<8x256xf32>
    %cst = arith.constant 0.000000e+00 : f32
    %33 = vector.broadcast %cst : f32 to vector<8x256xf32>
    %34 = arith.maximumf %32, %33 : vector<8x256xf32>
    %35 = math.absf %32 : vector<8x256xf32>
    %cst_7 = arith.constant 0.000000e+00 : f32
    %36 = vector.broadcast %cst_7 : f32 to vector<8x256xf32>
    %37 = arith.subf %36, %35 : vector<8x256xf32>
    %38 = math.exp %37 : vector<8x256xf32>
    %39 = math.log1p %38 : vector<8x256xf32>
    %40 = arith.addf %34, %39 : vector<8x256xf32>
    %c255_i32_8 = arith.constant 255 : i32
    %41 = tpu.dynamic_rotate %40 by %c255_i32_8 dim 1 : vector<8x256xf32>, i32 -> vector<8x256xf32>
    %c254_i32_9 = arith.constant 254 : i32
    %42 = tpu.dynamic_rotate %40 by %c254_i32_9 dim 1 : vector<8x256xf32>, i32 -> vector<8x256xf32>
    %43 = vector.broadcast %3 : f32 to vector<8x256xf32>
    %44 = arith.mulf %43, %40 : vector<8x256xf32>
    %45 = vector.broadcast %4 : f32 to vector<8x256xf32>
    %46 = arith.mulf %45, %41 : vector<8x256xf32>
    %47 = arith.addf %44, %46 : vector<8x256xf32>
    %48 = vector.broadcast %5 : f32 to vector<8x256xf32>
    %49 = arith.mulf %48, %42 : vector<8x256xf32>
    %50 = arith.addf %47, %49 : vector<8x256xf32>
    %51 = vector.broadcast %16 : f32 to vector<8x256xf32>
    %52 = arith.addf %50, %51 : vector<8x256xf32>
    %cst_10 = arith.constant 0.000000e+00 : f32
    %53 = vector.broadcast %cst_10 : f32 to vector<8x256xf32>
    %54 = arith.maximumf %52, %53 : vector<8x256xf32>
    %55 = math.absf %52 : vector<8x256xf32>
    %cst_11 = arith.constant 0.000000e+00 : f32
    %56 = vector.broadcast %cst_11 : f32 to vector<8x256xf32>
    %57 = arith.subf %56, %55 : vector<8x256xf32>
    %58 = math.exp %57 : vector<8x256xf32>
    %59 = math.log1p %58 : vector<8x256xf32>
    %60 = arith.addf %54, %59 : vector<8x256xf32>
    %c255_i32_12 = arith.constant 255 : i32
    %61 = tpu.dynamic_rotate %60 by %c255_i32_12 dim 1 : vector<8x256xf32>, i32 -> vector<8x256xf32>
    %c254_i32_13 = arith.constant 254 : i32
    %62 = tpu.dynamic_rotate %60 by %c254_i32_13 dim 1 : vector<8x256xf32>, i32 -> vector<8x256xf32>
    %63 = vector.broadcast %6 : f32 to vector<8x256xf32>
    %64 = arith.mulf %63, %60 : vector<8x256xf32>
    %65 = vector.broadcast %7 : f32 to vector<8x256xf32>
    %66 = arith.mulf %65, %61 : vector<8x256xf32>
    %67 = arith.addf %64, %66 : vector<8x256xf32>
    %68 = vector.broadcast %8 : f32 to vector<8x256xf32>
    %69 = arith.mulf %68, %62 : vector<8x256xf32>
    %70 = arith.addf %67, %69 : vector<8x256xf32>
    %71 = vector.broadcast %17 : f32 to vector<8x256xf32>
    %72 = arith.addf %70, %71 : vector<8x256xf32>
    %cst_14 = arith.constant 0.000000e+00 : f32
    %73 = vector.broadcast %cst_14 : f32 to vector<8x256xf32>
    %74 = arith.maximumf %72, %73 : vector<8x256xf32>
    %75 = math.absf %72 : vector<8x256xf32>
    %cst_15 = arith.constant 0.000000e+00 : f32
    %76 = vector.broadcast %cst_15 : f32 to vector<8x256xf32>
    %77 = arith.subf %76, %75 : vector<8x256xf32>
    %78 = math.exp %77 : vector<8x256xf32>
    %79 = math.log1p %78 : vector<8x256xf32>
    %80 = arith.addf %74, %79 : vector<8x256xf32>
    %c255_i32_16 = arith.constant 255 : i32
    %81 = tpu.dynamic_rotate %80 by %c255_i32_16 dim 1 : vector<8x256xf32>, i32 -> vector<8x256xf32>
    %c254_i32_17 = arith.constant 254 : i32
    %82 = tpu.dynamic_rotate %80 by %c254_i32_17 dim 1 : vector<8x256xf32>, i32 -> vector<8x256xf32>
    %83 = vector.broadcast %9 : f32 to vector<8x256xf32>
    %84 = arith.mulf %83, %80 : vector<8x256xf32>
    %85 = vector.broadcast %10 : f32 to vector<8x256xf32>
    %86 = arith.mulf %85, %81 : vector<8x256xf32>
    %87 = arith.addf %84, %86 : vector<8x256xf32>
    %88 = vector.broadcast %11 : f32 to vector<8x256xf32>
    %89 = arith.mulf %88, %82 : vector<8x256xf32>
    %90 = arith.addf %87, %89 : vector<8x256xf32>
    %91 = vector.broadcast %18 : f32 to vector<8x256xf32>
    %92 = arith.addf %90, %91 : vector<8x256xf32>
    %93 = vector.extract_strided_slice %92 {offsets = [0, 0], sizes = [8, 128], strides = [1, 1]} : vector<8x256xf32> to vector<8x128xf32>
    %c0_18 = arith.constant 0 : index
    %c0_19 = arith.constant 0 : index
    %94 = vector.load %arg4[%c0_18, %c0_19] : memref<8x128xf32, #tpu.memory_space<vmem>>, vector<8x128xf32>
    tpu.vector_store %arg4[%c0_18, %c0_19], %93 {strides = array<i32>} : memref<8x128xf32, #tpu.memory_space<vmem>>, vector<8x128xf32>,
    %95 = vector.broadcast %12 : f32 to vector<8x256xf32>
    %96 = arith.mulf %95, %80 : vector<8x256xf32>
    %97 = vector.broadcast %13 : f32 to vector<8x256xf32>
    %98 = arith.mulf %97, %81 : vector<8x256xf32>
    %99 = arith.addf %96, %98 : vector<8x256xf32>
    %100 = vector.broadcast %14 : f32 to vector<8x256xf32>
    %101 = arith.mulf %100, %82 : vector<8x256xf32>
    %102 = arith.addf %99, %101 : vector<8x256xf32>
    %103 = vector.broadcast %19 : f32 to vector<8x256xf32>
    %104 = arith.addf %102, %103 : vector<8x256xf32>
    %105 = math.exp %104 : vector<8x256xf32>
    %106 = vector.extract_strided_slice %105 {offsets = [0, 0], sizes = [8, 128], strides = [1, 1]} : vector<8x256xf32> to vector<8x128xf32>
    %c0_20 = arith.constant 0 : index
    %c0_21 = arith.constant 0 : index
    %107 = vector.load %arg5[%c0_20, %c0_21] : memref<8x128xf32, #tpu.memory_space<vmem>>, vector<8x128xf32>
    tpu.vector_store %arg5[%c0_20, %c0_21], %106 {strides = array<i32>} : memref<8x128xf32, #tpu.memory_space<vmem>>, vector<8x128xf32>,
    return
  }
  func.func @transform_0(%arg0: i32) -> i32 {
    %c0_i32 = arith.constant 0 : i32
    %c0_i32_0 = arith.constant 0 : i32
    return %c0_i32 : i32
  }
  func.func @transform_1(%arg0: i32) -> i32 {
    %c0_i32 = arith.constant 0 : i32
    %c0_i32_0 = arith.constant 0 : i32
    return %c0_i32 : i32
  }
  func.func @transform_2(%arg0: i32) -> (i32, i32) {
    %c0_i32 = arith.constant 0 : i32
    %c0_i32_0 = arith.constant 0 : i32
    return %arg0, %c0_i32 : i32, i32
  }
  func.func @transform_3(%arg0: i32) -> (i32, i32) {
    %c0_i32 = arith.constant 0 : i32
    %c0_i32_0 = arith.constant 0 : i32
    return %arg0, %c0_i32 : i32, i32
  }
  func.func @transform_4(%arg0: i32) -> (i32, i32) {
    %c0_i32 = arith.constant 0 : i32
    %c0_i32_0 = arith.constant 0 : i32
    return %arg0, %c0_i32 : i32, i32
  }
}

</mosaic_0001>

<bundles_post_ra>
// kernel: tpu_custom_call.1
= control target key start
LH: loop header
LB: loop body
LE: loop exit
PB: predicated region body
PF: predicated region fallthrough
CT: control target
= control target key end

     0   :  { %10 = vsyncpa [#allocation5], 0  ;;  %s554_s0 = inlined_call_operand.hbm [shape: f32[15], index: 0, kind: input, shape index: {}]   ;;  %s555_s1 = inlined_call_operand.vmem [shape: f32[5], index: 1, kind: input, shape index: {}]   ;;  %s556_s2 = inlined_call_operand.hbm [shape: f32[8,256], index: 2, kind: input, shape index: {}]   ;;  %s557_s3 = inlined_call_operand.hbm [shape: f32[8,128], index: 3, kind: output, shape index: {0}]   ;;  %s558_s4 = inlined_call_operand.hbm [shape: f32[8,128], index: 4, kind: output, shape index: {1}]  }
   0x1   :  { %11 = vsyncpa [#allocation6], 0 }
   0x2   :  { %12 = vsyncpa [#allocation3], 0 }
   0x3   :  { %13 = vsyncpa [#allocation4], 0 }
   0x4   :  { %14 = vsyncpa [#allocation11], 0  ;;  %s29_s17 = sshll.u32 %s555_s1, 4  ;;  %s459_s18 = smov [#allocation2]   ;;  %s30_s17 = int_to_ptr.vmem [resolvable:$true] %s29_s17 }
   0x5   :  { %22 = dma.hbm_to_smem %s554_s0, 16, %s459_s18, [#allocation5]  }
   0x6   :  { %s377_s21 = scalar_lea.vmem %s30_s17, 16  ;;  %p382_p1 = scmp.lt.s32.totalorder %s30_s17, %s30_s17 }
   0x7   :  { %p378_p0 = scmp.ne.s32.totalorder %s30_s17, %s377_s21  ;;  %p383_p2 = scmp.lt.s32.totalorder %s377_s21, %s377_s21 }
   0x9   :  { %p384_p3 = por %p383_p2, %p382_p1 }
   0xb   :  { %p385_p4 = pnand %p384_p3, %p378_p0 }
   0xd   :  { %388 = shalt.err (!%p385_p4)
}
   0xe   :  { %s460_s22 = smov [#allocation7]   ;;  %s461_s23 = smov [#allocation8]  }
   0xf   :  { %32 = dma.vmem_to_smem %s30_s17, 16, %s460_s22, [#allocation6]  }
  0x10   :  { %s39_s24 = sshll.u32 %s461_s23, 4  ;;  %s40_s24 = int_to_ptr.vmem [resolvable:$true] %s39_s24 }
  0x11   :  { %s397_s25 = scalar_lea.vmem %s40_s24, 256  ;;  %p402_p6 = scmp.lt.s32.totalorder %s40_s24, %s40_s24 }
  0x12   :  { %p398_p5 = scmp.ne.s32.totalorder %s40_s24, %s397_s25  ;;  %p403_p7 = scmp.lt.s32.totalorder %s397_s25, %s397_s25 }
  0x14   :  { %p404_p8 = por %p403_p7, %p402_p6 }
  0x16   :  { %p405_p9 = pnand %p404_p8, %p398_p5 }
  0x18   :  { %408 = shalt.err (!%p405_p9)
}
  0x19   :  { %42 = dma.hbm_to_vmem [thread:$0]  %s556_s2, 256, %s40_s24, [#allocation3]  }
  0x1a   :  { %449 = dma.done.wait [#allocation5], 16  }
  0x1b   :  { %450 = vsyncadd [#allocation5], 4294967280 }
  0x1c   :  { %451 = dma.done.wait [#allocation6], 16  }
  0x1d   :  { %452 = vsyncadd [#allocation6], 4294967280 }
  0x1e   :  { %453 = dma.done.wait [#allocation3], 256  }
  0x1f   :  { %454 = vsyncadd [#allocation3], 4294967040 }
  0x20   :  { %52 = sfence }
  0x21   :  { %v73_v0 = vld [vmem:[#allocation8] sm:$0xff]  ;;  %s462_s26 = smov 126   ;;  %s463_s27 = smov 127   ;;  %v74_v1 = vld [vmem:[#allocation8 + $0x8] sm:$0xff]  ;;  %v79_v2 = vlaneseq }
  0x22   :  { %84 = vrot.lane.b32.xlu1 %v73_v0, %s462_s26  ;;  %75 = vrot.lane.b32.xlu0 %v73_v0, %s463_s27  ;;  %s53_s2 = sld [smem:[#allocation2]]  ;;  %s464_s21 = smov [#allocation9]  }
  0x23   :  { %s318_s28 = sld [smem:[#allocation2 + $0x1]]  ;;  %v504_v3 = vand.u32 127, %v79_v2  ;;  %s293_s22 = sshll.u32 %s464_s21, 4  ;;  %s294_s22 = int_to_ptr.vmem [resolvable:$true] %s293_s22 }
  0x24   :  { %s319_s29 = sld [smem:[#allocation2 + $0x2]]  ;;  %s409_s23 = scalar_lea.vmem %s294_s22, 128 }
  0x25   :  { %s68_s30 = sld [smem:[#allocation7]]  ;;  %vm88_vm0 = vcmp.lt.s32.totalorder %v504_v3, 126  ;;  %vm81_vm1 = vcmp.lt.s32.totalorder %v504_v3, 127  ;;  %p410_p10 = scmp.ne.s32.totalorder %s294_s22, %s409_s23 }
  0x26   :  { %86 = vrot.lane.b32.xlu1 %v74_v1, %s462_s26  ;;  %77 = vrot.lane.b32.xlu0 %v74_v1, %s463_s27  ;;  %s321_s5 = sld [smem:[#allocation2 + $0x4]]  ;;  %p414_p11 = scmp.lt.s32.totalorder %s294_s22, %s294_s22 }
  0x27   :  { %s320_s6 = sld [smem:[#allocation2 + $0x3]]  ;;  %p415_p12 = scmp.lt.s32.totalorder %s409_s23, %s409_s23 }
  0x28   :  { %v91_v6 = vstv %s53_s2  ;;  %s322_s7 = sld [smem:[#allocation2 + $0x5]] }
  0x29   :  { %v94_v8 = vstv %s318_s28  ;;  %v92_v9 = vmul.f32 %v91_v6, %v73_v0  ;;  %v93_v10 = vmul.f32 %v91_v6, %v74_v1  ;;  %s332_s8 = sld [smem:[#allocation7 + $0x1]]  ;;  %p416_p13 = por %p415_p12, %p414_p11 }
  0x2a   :  { %v99_v11 = vstv %s319_s29  ;;  %s324_s9 = sld [smem:[#allocation2 + $0x7]] }
  0x2b   :  { %v104_v23 = vstv %s68_s30  ;;  %s323_s10 = sld [smem:[#allocation2 + $0x6]]  ;;  %p417_p0 = pnand %p416_p13, %p410_p10 }
  0x2c   :  { %v152_v57 = vstv %s321_s5  ;;  %s325_s11 = sld [smem:[#allocation2 + $0x8]] }
  0x2d   :  { %v149_v59 = vstv %s320_s6  ;;  %s333_s12 = sld [smem:[#allocation7 + $0x2]] }
  0x2e   :  { %v157_v1 = vstv %s322_s7  ;;  %s327_s13 = sld [smem:[#allocation2 + $0xa]] }
  0x2f   :  { %s330_s14 = sld [smem:[#allocation2 + $0xd]] }
  0x30   :  { %s326_s15 = sld [smem:[#allocation2 + $0x9]] }
  0x31   :  { %s329_s16 = sld [smem:[#allocation2 + $0xc]] }
  0x32   :  { %s328_s17 = sld [smem:[#allocation2 + $0xb]] }
  0x33   :  { %s331_s18 = sld [smem:[#allocation2 + $0xe]] }
  0x34   :  { %s334_s19 = sld [smem:[#allocation7 + $0x3]] }
  0x35   :  { %s335_s20 = sld [smem:[#allocation7 + $0x4]] }
  0x94   :  { %v85_v4 = vpop.permute.xlu1 %84  ;;  %v76_v5 = vpop.permute.xlu0 %75 }
  0x98   :  { %v87_v7 = vpop.permute.xlu1 %86  ;;  %v78_v12 = vpop.permute.xlu0 %77 }
  0x99   :  { %v89_v13 = vsel %vm88_vm0, %v85_v4, %v87_v7  ;;  %v90_v14 = vsel %vm88_vm0, %v87_v7, %v85_v4  ;;  %v82_v15 = vsel %vm81_vm1, %v76_v5, %v78_v12  ;;  %v83_v16 = vsel %vm81_vm1, %v78_v12, %v76_v5 }
  0x9a   :  { %v95_v17 = vmul.f32 %v94_v8, %v82_v15  ;;  %v96_v18 = vmul.f32 %v94_v8, %v83_v16  ;;  %v100_v19 = vmul.f32 %v99_v11, %v89_v13  ;;  %v101_v20 = vmul.f32 %v99_v11, %v90_v14 }
  0x9b   :  { %v162_v12 = vstv %s332_s8 }
  0x9c   :  { %v97_v21 = vadd.f32 %v95_v17, %v92_v9  ;;  %v98_v22 = vadd.f32 %v96_v18, %v93_v10 }
  0x9e   :  { %v102_v24 = vadd.f32 %v100_v19, %v97_v21  ;;  %v103_v25 = vadd.f32 %v101_v20, %v98_v22 }
  0xa0   :  { %v106_v26 = vadd.f32 %v104_v23, %v103_v25  ;;  %v105_v27 = vadd.f32 %v104_v23, %v102_v24 }
  0xa2   :  { %v110_v28 = vand.u32 2147483647, %v106_v26  ;;  %v109_v29 = vand.u32 2147483647, %v105_v27  ;;  %v108_v48 = vmax.f32 %v106_v26, 0.0  ;;  %v107_v52 = vmax.f32 %v105_v27, 0.0 }
  0xa4   :  { %v112_v30 = vsub.f32 0.0, %v110_v28  ;;  %v111_v31 = vsub.f32 0.0, %v109_v29 }
  0xa6   :  { %v115_v32 = vmul.f32 1.442695, %v112_v30  ;;  %v113_v33 = vmul.f32 1.442695, %v111_v31 }
  0xa8   :  { %343 = vpow2.f32 %v115_v32 }
  0xa9   :  { %345 = vpow2.f32 %v113_v33 }
  0xb5   :  { %v344_v34 = vpop.eup %343 }
  0xb6   :  { %v346_v35 = vpop.eup %345  ;;  %v126_v36 = vadd.f32 1.0, %v344_v34  ;;  %v129_v38 = vmul.f32 -0.5, %v344_v34  ;;  %v132_v41 = vand.u32 2147483647, %v344_v34 }
  0xb7   :  { %v117_v37 = vadd.f32 1.0, %v346_v35  ;;  %v120_v39 = vmul.f32 -0.5, %v346_v35  ;;  %v123_v43 = vand.u32 2147483647, %v346_v35 }
  0xb8   :  { %347 = vlog2.f32 %v126_v36  ;;  %v130_v40 = vadd.f32 1.0, %v129_v38  ;;  %vm133_vm2 = vcmp.lt.f32.partialorder %v132_v41, 0.0004427343 }
  0xb9   :  { %349 = vlog2.f32 %v117_v37  ;;  %v121_v42 = vadd.f32 1.0, %v120_v39  ;;  %vm124_vm3 = vcmp.lt.f32.partialorder %v123_v43, 0.0004427343 }
  0xba   :  { %v131_v47 = vmul.f32 %v344_v34, %v130_v40 }
  0xbb   :  { %v122_v50 = vmul.f32 %v346_v35, %v121_v42 }
  0xc5   :  { %v348_v44 = vpop.eup %347 }
  0xc6   :  { %v350_v45 = vpop.eup %349  ;;  %v128_v46 = vmul.f32 0.6931472, %v348_v44 }
  0xc7   :  { %v119_v49 = vmul.f32 0.6931472, %v350_v45  ;;  %v210_v45 = vstv %s324_s9 }
  0xc8   :  { %v134_v51 = vsel %vm133_vm2, %v131_v47, %v128_v46 }
  0xc9   :  { %v136_v53 = vadd.f32 %v134_v51, %v108_v48  ;;  %v125_v54 = vsel %vm124_vm3, %v122_v50, %v119_v49  ;;  %v207_v48 = vstv %s323_s10 }
  0xca   :  { %v135_v55 = vadd.f32 %v125_v54, %v107_v52 }
  0xcb   :  { %139 = vrot.lane.b32.xlu1 %v136_v53, %s463_s27  ;;  %v151_v2 = vmul.f32 %v149_v59, %v136_v53 }
  0xcc   :  { %137 = vrot.lane.b32.xlu0 %v135_v55, %s463_s27  ;;  %v150_v4 = vmul.f32 %v149_v59, %v135_v55 }
  0xcf   :  { %145 = vrot.lane.b32.xlu1 %v136_v53, %s462_s26  ;;  %v215_v53 = vstv %s325_s11 }
  0xd0   :  { %143 = vrot.lane.b32.xlu0 %v135_v55, %s462_s26 }
 0x13d   :  { %v140_v56 = vpop.permute.xlu1 %139 }
 0x13e   :  { %v138_v58 = vpop.permute.xlu0 %137 }
 0x13f   :  { %v141_v60 = vsel %vm81_vm1, %v138_v58, %v140_v56  ;;  %v142_v61 = vsel %vm81_vm1, %v140_v56, %v138_v58 }
 0x140   :  { %v153_v62 = vmul.f32 %v152_v57, %v141_v60  ;;  %v154_v63 = vmul.f32 %v152_v57, %v142_v61 }
 0x141   :  { %v146_v0 = vpop.permute.xlu1 %145 }
 0x142   :  { %v144_v5 = vpop.permute.xlu0 %143  ;;  %v155_v8 = vadd.f32 %v153_v62, %v150_v4  ;;  %v156_v9 = vadd.f32 %v154_v63, %v151_v2 }
 0x143   :  { %v147_v6 = vsel %vm88_vm0, %v144_v5, %v146_v0  ;;  %v148_v7 = vsel %vm88_vm0, %v146_v0, %v144_v5  ;;  %v220_v0 = vstv %s333_s12 }
 0x144   :  { %v158_v10 = vmul.f32 %v157_v1, %v147_v6  ;;  %v159_v11 = vmul.f32 %v157_v1, %v148_v7 }
 0x146   :  { %v160_v13 = vadd.f32 %v158_v10, %v155_v8  ;;  %v161_v14 = vadd.f32 %v159_v11, %v156_v9 }
 0x148   :  { %v163_v15 = vadd.f32 %v162_v12, %v160_v13  ;;  %v164_v16 = vadd.f32 %v162_v12, %v161_v14 }
 0x14a   :  { %v167_v17 = vand.u32 2147483647, %v163_v15  ;;  %v168_v18 = vand.u32 2147483647, %v164_v16  ;;  %v165_v39 = vmax.f32 %v163_v15, 0.0  ;;  %v166_v40 = vmax.f32 %v164_v16, 0.0 }
 0x14c   :  { %v169_v19 = vsub.f32 0.0, %v167_v17  ;;  %v170_v20 = vsub.f32 0.0, %v168_v18 }
 0x14e   :  { %v171_v21 = vmul.f32 1.442695, %v169_v19  ;;  %v173_v22 = vmul.f32 1.442695, %v170_v20 }
 0x150   :  { %351 = vpow2.f32 %v171_v21 }
 0x151   :  { %353 = vpow2.f32 %v173_v22 }
 0x15d   :  { %v352_v23 = vpop.eup %351 }
 0x15e   :  { %v354_v24 = vpop.eup %353  ;;  %v175_v25 = vadd.f32 1.0, %v352_v23  ;;  %v178_v27 = vmul.f32 -0.5, %v352_v23  ;;  %v181_v31 = vand.u32 2147483647, %v352_v23 }
 0x15f   :  { %v184_v26 = vadd.f32 1.0, %v354_v24  ;;  %v187_v28 = vmul.f32 -0.5, %v354_v24  ;;  %v190_v32 = vand.u32 2147483647, %v354_v24 }
 0x160   :  { %355 = vlog2.f32 %v175_v25  ;;  %v179_v29 = vadd.f32 1.0, %v178_v27  ;;  %vm182_vm4 = vcmp.lt.f32.partialorder %v181_v31, 0.0004427343 }
 0x161   :  { %357 = vlog2.f32 %v184_v26  ;;  %v188_v30 = vadd.f32 1.0, %v187_v28  ;;  %vm191_vm5 = vcmp.lt.f32.partialorder %v190_v32, 0.0004427343 }
 0x162   :  { %v180_v36 = vmul.f32 %v352_v23, %v179_v29 }
 0x163   :  { %v189_v38 = vmul.f32 %v354_v24, %v188_v30 }
 0x16d   :  { %v356_v33 = vpop.eup %355 }
 0x16e   :  { %v358_v34 = vpop.eup %357  ;;  %v177_v35 = vmul.f32 0.6931472, %v356_v33 }
 0x16f   :  { %v186_v37 = vmul.f32 0.6931472, %v358_v34  ;;  %v265_v34 = vstv %s327_s13 }
 0x170   :  { %v183_v41 = vsel %vm182_vm4, %v180_v36, %v177_v35  ;;  %v276_v35 = vstv %s330_s14 }
 0x171   :  { %v192_v42 = vsel %vm191_vm5, %v189_v38, %v186_v37  ;;  %v193_v43 = vadd.f32 %v183_v41, %v165_v39  ;;  %v263_v38 = vstv %s326_s15  ;;  %v274_v39 = vstv %s329_s16 }
 0x172   :  { %v194_v44 = vadd.f32 %v192_v42, %v166_v40 }
 0x173   :  { %195 = vrot.lane.b32.xlu0 %v193_v43, %s463_s27  ;;  %v208_v56 = vmul.f32 %v207_v48, %v193_v43 }
 0x174   :  { %197 = vrot.lane.b32.xlu1 %v194_v44, %s463_s27  ;;  %v209_v55 = vmul.f32 %v207_v48, %v194_v44 }
 0x177   :  { %201 = vrot.lane.b32.xlu0 %v193_v43, %s462_s26  ;;  %v268_v43 = vstv %s328_s17 }
 0x178   :  { %203 = vrot.lane.b32.xlu1 %v194_v44, %s462_s26  ;;  %v279_v44 = vstv %s331_s18 }
 0x1e5   :  { %v196_v46 = vpop.permute.xlu0 %195 }
 0x1e6   :  { %v198_v47 = vpop.permute.xlu1 %197 }
 0x1e7   :  { %v199_v49 = vsel %vm81_vm1, %v196_v46, %v198_v47  ;;  %v200_v50 = vsel %vm81_vm1, %v198_v47, %v196_v46 }
 0x1e8   :  { %v211_v51 = vmul.f32 %v210_v45, %v199_v49  ;;  %v212_v52 = vmul.f32 %v210_v45, %v200_v50 }
 0x1e9   :  { %v202_v54 = vpop.permute.xlu0 %201 }
 0x1ea   :  { %v204_v57 = vpop.permute.xlu1 %203  ;;  %v213_v60 = vadd.f32 %v211_v51, %v208_v56  ;;  %v214_v61 = vadd.f32 %v212_v52, %v209_v55  ;;  %v282_v55 = vstv %s335_s20 }
 0x1eb   :  { %v205_v58 = vsel %vm88_vm0, %v202_v54, %v204_v57  ;;  %v206_v59 = vsel %vm88_vm0, %v204_v57, %v202_v54  ;;  %v271_v54 = vstv %s334_s19 }
 0x1ec   :  { %v216_v62 = vmul.f32 %v215_v53, %v205_v58  ;;  %v217_v63 = vmul.f32 %v215_v53, %v206_v59 }
 0x1ee   :  { %v218_v1 = vadd.f32 %v216_v62, %v213_v60  ;;  %v219_v2 = vadd.f32 %v217_v63, %v214_v61 }
 0x1f0   :  { %v221_v4 = vadd.f32 %v220_v0, %v218_v1  ;;  %v222_v5 = vadd.f32 %v220_v0, %v219_v2 }
 0x1f2   :  { %v225_v6 = vand.u32 2147483647, %v221_v4  ;;  %v226_v7 = vand.u32 2147483647, %v222_v5  ;;  %v223_v26 = vmax.f32 %v221_v4, 0.0  ;;  %v224_v29 = vmax.f32 %v222_v5, 0.0 }
 0x1f4   :  { %v227_v8 = vsub.f32 0.0, %v225_v6  ;;  %v228_v9 = vsub.f32 0.0, %v226_v7 }
 0x1f6   :  { %v229_v10 = vmul.f32 1.442695, %v227_v8  ;;  %v231_v11 = vmul.f32 1.442695, %v228_v9 }
 0x1f8   :  { %359 = vpow2.f32 %v229_v10 }
 0x1f9   :  { %361 = vpow2.f32 %v231_v11 }
 0x205   :  { %v360_v12 = vpop.eup %359 }
 0x206   :  { %v362_v13 = vpop.eup %361  ;;  %v233_v14 = vadd.f32 1.0, %v360_v12  ;;  %v236_v16 = vmul.f32 -0.5, %v360_v12  ;;  %v239_v20 = vand.u32 2147483647, %v360_v12 }
 0x207   :  { %v242_v15 = vadd.f32 1.0, %v362_v13  ;;  %v245_v17 = vmul.f32 -0.5, %v362_v13  ;;  %v248_v21 = vand.u32 2147483647, %v362_v13 }
 0x208   :  { %363 = vlog2.f32 %v233_v14  ;;  %v237_v18 = vadd.f32 1.0, %v236_v16  ;;  %vm240_vm6 = vcmp.lt.f32.partialorder %v239_v20, 0.0004427343 }
 0x209   :  { %365 = vlog2.f32 %v242_v15  ;;  %v246_v19 = vadd.f32 1.0, %v245_v17  ;;  %vm249_vm7 = vcmp.lt.f32.partialorder %v248_v21, 0.0004427343 }
 0x20a   :  { %v238_v25 = vmul.f32 %v360_v12, %v237_v18 }
 0x20b   :  { %v247_v28 = vmul.f32 %v362_v13, %v246_v19 }
 0x215   :  { %v364_v22 = vpop.eup %363 }
 0x216   :  { %v366_v23 = vpop.eup %365  ;;  %v235_v24 = vmul.f32 0.6931472, %v364_v22 }
 0x217   :  { %v244_v27 = vmul.f32 0.6931472, %v366_v23 }
 0x218   :  { %v241_v30 = vsel %vm240_vm6, %v238_v25, %v235_v24 }
 0x219   :  { %v250_v31 = vsel %vm249_vm7, %v247_v28, %v244_v27  ;;  %v251_v32 = vadd.f32 %v241_v30, %v223_v26 }
 0x21a   :  { %v252_v33 = vadd.f32 %v250_v31, %v224_v29 }
 0x21b   :  { %253 = vrot.lane.b32.xlu0 %v251_v32, %s463_s27  ;;  %v264_v46 = vmul.f32 %v263_v38, %v251_v32  ;;  %v275_v47 = vmul.f32 %v274_v39, %v251_v32 }
 0x21c   :  { %255 = vrot.lane.b32.xlu1 %v252_v33, %s463_s27 }
 0x21f   :  { %258 = vrot.lane.b32.xlu0 %v251_v32, %s462_s26 }
 0x220   :  { %260 = vrot.lane.b32.xlu1 %v252_v33, %s462_s26 }
 0x28d   :  { %v254_v36 = vpop.permute.xlu0 %253 }
 0x28e   :  { %v256_v37 = vpop.permute.xlu1 %255 }
 0x28f   :  { %v257_v40 = vsel %vm81_vm1, %v254_v36, %v256_v37 }
 0x290   :  { %v266_v41 = vmul.f32 %v265_v34, %v257_v40  ;;  %v277_v42 = vmul.f32 %v276_v35, %v257_v40 }
 0x291   :  { %v259_v45 = vpop.permute.xlu0 %258 }
 0x292   :  { %v261_v48 = vpop.permute.xlu1 %260  ;;  %v267_v50 = vadd.f32 %v266_v41, %v264_v46  ;;  %v278_v51 = vadd.f32 %v277_v42, %v275_v47 }
 0x293   :  { %v262_v49 = vsel %vm88_vm0, %v259_v45, %v261_v48 }
 0x294   :  { %v269_v52 = vmul.f32 %v268_v43, %v262_v49  ;;  %v280_v53 = vmul.f32 %v279_v44, %v262_v49 }
 0x296   :  { %v281_v56 = vadd.f32 %v280_v53, %v278_v51  ;;  %v270_v57 = vadd.f32 %v269_v52, %v267_v50 }
 0x298   :  { %v272_v58 = vadd.f32 %v271_v54, %v270_v57  ;;  %v283_v59 = vadd.f32 %v282_v55, %v281_v56 }
 0x29a   :  { %273 = vst [vmem:[#allocation9] sm:$0xff] %v272_v58  ;;  %v284_v60 = vmul.f32 1.442695, %v283_v59 }
 0x29b   :  { %420 = shalt.err (!%p417_p0)
}
 0x29c   :  { %296 = dma.vmem_to_hbm [thread:$0]  %s294_s22, 128, %s557_s3, [#allocation4]   ;;  %367 = vpow2.f32 %v284_v60 }
 0x29d   :  { %s465_s0 = smov [#allocation10]  }
 0x29e   :  { %s303_s1 = sshll.u32 %s465_s0, 4  ;;  %s304_s1 = int_to_ptr.vmem [resolvable:$true] %s303_s1 }
 0x29f   :  { %s429_s26 = scalar_lea.vmem %s304_s1, 128  ;;  %p434_p2 = scmp.lt.s32.totalorder %s304_s1, %s304_s1 }
 0x2a0   :  { %p430_p1 = scmp.ne.s32.totalorder %s304_s1, %s429_s26  ;;  %p435_p3 = scmp.lt.s32.totalorder %s429_s26, %s429_s26 }
 0x2a2   :  { %p436_p4 = por %p435_p3, %p434_p2 }
 0x2a4   :  { %p437_p5 = pnand %p436_p4, %p430_p1 }
 0x2a9   :  { %v368_v3 = vpop.eup %367 }
 0x2aa   :  { %286 = vst [vmem:[#allocation10] sm:$0xff] %v368_v3 }
 0x2ab   :  { %440 = shalt.err (!%p437_p5)
}
 0x2ac   :  { %306 = dma.vmem_to_hbm [thread:$0]  %s304_s1, 128, %s558_s4, [#allocation11]  }
 0x2ad   :  { %455 = dma.done.wait [#allocation4], 128  }
 0x2ae   :  { %456 = vsyncadd [#allocation4], 4294967168 }
 0x2af   :  { %457 = dma.done.wait [#allocation11], 128  }
 0x2b0   :  { %458 = vsyncadd [#allocation11], 4294967168 }
 0x2b1   :  { %313 = vsyncpa [#allocation3], 1 }
 0x2b2   :  { %314 = vsyncpa [#allocation4], 1 }
 0x2b3   :  { %315 = vsyncpa [#allocation11], 1 }
 0x2b4   :  { %316 = vsyncpa [#allocation5], 1 }
 0x2b5   :  { %317 = vsyncpa [#allocation6], 1 }

</bundles_post_ra>
